<compile_context>
chip_gen: v6e
topology: v6e:2x2x1
jax: 0.10.0
libtpu: 0.0.40
codegen_flags: <defaults>
</compile_context>

<pallas_src>
import functools

import numpy as np
import jax
import jax.numpy as jnp
from jax.experimental import pallas as pl
from jax.experimental.pallas import tpu as pltpu

_LOWERING_ERR = getattr(pltpu, "LoweringException", NotImplementedError)


def _round_up(x: int, m: int) -> int:
    return ((x + m - 1) // m) * m


def _cdiv(a: int, b: int) -> int:
    return -(-a // b)


# ----------------------------------------------------------------------------
# Basis setup (host-side, numpy float64) — mirrors icmdct()*sqrt(2) math with
# the synthesis window folded in as a per-output-sample (row) scale.
# ----------------------------------------------------------------------------
def build_windowed_imdct_matrix(n_bins: int, window) -> np.ndarray:
    """Returns Mw of shape (2N, N) float64 such that for a real coefficient
    vector X (length N):  window * _imdct(X) == Mw @ X  (odd=True path)."""
    N = int(n_bins)
    n0 = (N + 1) / 2.0
    m = np.arange(2 * N, dtype=np.float64)
    pre_twiddle = np.exp(1j * np.pi * n0 * m / N)            # (2N,)
    post_twiddle = np.exp(1j * np.pi * (m + n0) / (2 * N))   # (2N,)

    eye = np.eye(N, dtype=np.float64)
    # Y[:N] = X ; Y[N:] = -conj(flip(X))  (X real -> -flip(X))
    Y = np.concatenate([eye, -eye[::-1, :]], axis=0)         # (2N, N)
    y = np.fft.ifft(Y * pre_twiddle[:, None], axis=0)        # (2N, N) complex
    M = np.real(y * post_twiddle[:, None]) * np.sqrt(N) * np.sqrt(2.0)
    w = np.asarray(window, dtype=np.float64).reshape(2 * N)
    return M * w[:, None]                                    # (2N, N)


# ----------------------------------------------------------------------------
# Roll-convention probe (one-time).  Returns the pltpu.roll shift that maps
# row j -> row j+1 (jnp.roll convention => +1), or None if roll is unusable
# (the kernel then falls back to the concat formulation).
# ----------------------------------------------------------------------------
@functools.lru_cache(maxsize=None)
def _roll_down_shift():
    def k(x_ref, o_ref):
        o_ref[...] = pltpu.roll(x_ref[...], shift=1, axis=0)

    try:
        x = jnp.broadcast_to(jnp.arange(8, dtype=jnp.float32)[:, None], (8, 128))
        y = pl.pallas_call(
            k, out_shape=jax.ShapeDtypeStruct((8, 128), jnp.float32))(x)
        col = np.asarray(jax.block_until_ready(y))[:, 0]
        base = np.arange(8, dtype=np.float64)
        if np.array_equal(col, np.roll(base, 1)):
            return 1
        if np.array_equal(col, np.roll(base, -1)):
            return -1
        return None
    except Exception:  # roll unsupported on this build -> concat fallback
        return None


# ----------------------------------------------------------------------------
# Fused Pallas kernel: per-tile IMDCT matmuls + windowing + overlap-add.
# ----------------------------------------------------------------------------
def _imdct_ola_kernel(x_ref, wf_ref, ws_ref, o_ref, carry_ref, *, roll_shift):
    # x_ref:     (tf, N)  MDCT coefficients, frames-major
    # wf_ref:    (N, N)   windowed IMDCT basis, first-half columns (transposed)
    # ws_ref:    (N, N)   windowed IMDCT basis, second-half columns (transposed)
    # o_ref:     (tf, N)  hop-sized output segments (f32):
    #                     o[t] = first_half(frame t) + second_half(frame t-1)
    # carry_ref: (1, N)   f32 scratch: second half of the previous tile's last
    #                     frame (per-chunk, so the outer grid axis can be
    #                     parallel across TensorCores).
    tf = o_ref.shape[0]

    @pl.when(pl.program_id(1) == 0)
    def _init():
        carry_ref[...] = jnp.zeros_like(carry_ref)

    x = x_ref[...]
    first = jnp.dot(x, wf_ref[...], preferred_element_type=jnp.float32)
    second = jnp.dot(x, ws_ref[...], preferred_element_type=jnp.float32)

    if roll_shift is not None:
        # Row-shift via the XLU (no misaligned VMEM copy), then fix row 0.
        shifted = pltpu.roll(second, shift=roll_shift, axis=0)
        o_ref[...] = first + shifted
        o_ref[0:1, :] = first[0:1, :] + carry_ref[...]
    else:
        shifted = jnp.concatenate([carry_ref[...], second[: tf - 1, :]], axis=0)
        o_ref[...] = first + shifted
    carry_ref[...] = second[tf - 1:, :]


def _make_imdct_ola_call(N, F_pad, tf, num_chunks, tiles_per_chunk,
                         compute_dtype, pipelined, roll_shift, vmem_limit):
    total_steps = num_chunks * tiles_per_chunk
    x_kwargs, w_kwargs = {}, {}
    if pipelined:
        # The basis blocks never change (constant index_map); double-buffering
        # them is pure VMEM waste.
        w_kwargs["pipeline_mode"] = pl.Buffered(1)
        if total_steps >= 3:
            # Deeper input pipelining helps hide exposed DMA on v6e.
            x_kwargs["pipeline_mode"] = pl.Buffered(3)

    kernel = functools.partial(_imdct_ola_kernel, roll_shift=roll_shift)
    return pl.pallas_call(
        kernel,
        out_shape=jax.ShapeDtypeStruct((F_pad, N), jnp.float32),
        grid_spec=pltpu.PrefetchScalarGridSpec(
            num_scalar_prefetch=0,
            grid=(num_chunks, tiles_per_chunk),
            in_specs=[
                pl.BlockSpec((tf, N),
                             lambda c, i: (c * tiles_per_chunk + i, 0),
                             **x_kwargs),
                pl.BlockSpec((N, N), lambda c, i: (0, 0), **w_kwargs),
                pl.BlockSpec((N, N), lambda c, i: (0, 0), **w_kwargs),
            ],
            out_specs=pl.BlockSpec((tf, N),
                                   lambda c, i: (c * tiles_per_chunk + i, 0)),
            scratch_shapes=[pltpu.VMEM((1, N), jnp.float32)],
        ),
        compiler_params=pltpu.CompilerParams(
            # Outer chunk axis is parallel (uses both v7x TensorCores); the OLA
            # carry only makes the inner frame-tile axis sequential.
            dimension_semantics=("parallel", "arbitrary"),
            vmem_limit_bytes=vmem_limit,
        ),
    )


def _choose_tiling(N, F, itemsize, pipelined):
    """Pick (num_chunks, tiles_per_chunk, tf, per_chunk, F_pad, F_out, vmem_limit)."""
    F_out = F + 1                        # OLA emits F+1 hop-sized segments
    F8 = _round_up(F_out, 8)

    # Two independent frame chunks -> both v7x TensorCores; on 1-TC chips the
    # extra outer axis just runs sequentially at no cost.
    num_chunks = 2 if F8 >= 16 else 1

    # VMEM accounting (bytes): resident weights + per-frame-row block cost.
    n_x_buf = 3 if pipelined else 2
    n_w_buf = 1 if pipelined else 2
    w_bytes = 2 * N * N * itemsize * n_w_buf
    row_bytes = N * itemsize * n_x_buf + 2 * N * 4 + 3 * N * 4  # x, out, temps
    budget = 40 * 1024 * 1024            # leaves headroom on v7x's 64 MiB VMEM
    avail = budget - w_bytes - N * 4 - (2 << 20)
    if avail < 8 * row_bytes:
        # TODO(synk): tile the (N, N) weight matrices over a K grid axis for
        # very large n_fft (>= 8192) instead of failing here.
        raise ValueError(f"n_bins={N} too large for a VMEM-resident IMDCT basis")
    tf_vmem_max = max(8, (avail // row_bytes) // 8 * 8)

    # Enough MXU rows per grid step to amortize ~0.35us per-step overhead.
    tf_target = max(256, (128 * 1024) // max(N, 1))
    tf_target = max(8, min(tf_target, tf_vmem_max))

    # Minimize last-tile padding: shrink tf so the tiles tightly cover F8.
    per_chunk_min = _round_up(_cdiv(F8, num_chunks), 8)
    tiles_per_chunk = _cdiv(per_chunk_min, tf_target)
    tf = _round_up(_cdiv(per_chunk_min, tiles_per_chunk), 8)
    per_chunk = tf * tiles_per_chunk
    F_pad = num_chunks * per_chunk

    footprint = w_bytes + tf * row_bytes + N * 4
    vmem_limit = int(min(max(footprint * 5 // 4 + (2 << 20), 32 << 20), 48 << 20))
    return num_chunks, tiles_per_chunk, tf, per_chunk, F_pad, F_out, vmem_limit


# ----------------------------------------------------------------------------
# Wrapper: full IMDCT forward
# ----------------------------------------------------------------------------
def imdct_forward(X, window, step_length=None, out_length=None, center=True,
                  compute_dtype=jnp.bfloat16):
    """X: (N_bins, F) spectrogram (bins x frames). Returns the 1-D signal.

    compute_dtype: MXU operand dtype.  bf16 runs at full MXU rate on all
      generations with f32 accumulation (~1e-3 relative reconstruction error);
      pass jnp.float32 for a bit-closer (slower) match.
    """
    assert X.ndim == 2, "mono (bins x frames) only"  # TODO(synk): multichannel
    N, F = X.shape
    frame_length = int(np.shape(window)[0])
    assert frame_length == 2 * N, "window length must be 2 * n_bins"
    hop = N if step_length is None else int(step_length)
    # TODO(synk): arbitrary hop sizes (overlap != 2) are not implemented; the
    # reference mdct/stft pipeline only reconstructs perfectly at hop = N anyway.
    assert hop == N, "only 50% overlap (hop = frame_length // 2) supported"

    # (2N, N) synthesis matrix with the window folded in, split into the two
    # frame halves and transposed so the kernel computes x @ W.
    Mw = build_windowed_imdct_matrix(N, window)
    Wf_T = jnp.asarray(np.ascontiguousarray(Mw[:N, :].T), dtype=compute_dtype)
    Ws_T = jnp.asarray(np.ascontiguousarray(Mw[N:, :].T), dtype=compute_dtype)

    itemsize = jnp.dtype(compute_dtype).itemsize
    roll_shift = _roll_down_shift()

    def build_runner(pipelined):
        (num_chunks, tiles_per_chunk, tf, per_chunk, F_pad, F_out,
         vmem_limit) = _choose_tiling(N, F, itemsize, pipelined)
        call = _make_imdct_ola_call(N, F_pad, tf, num_chunks, tiles_per_chunk,
                                    compute_dtype, pipelined, roll_shift,
                                    vmem_limit)

        def run(Xd, Wf, Ws):
            # Frames-major coefficients, zero-padded to the tile grid (IMDCT of
            # zeros is zero; the padding also yields the final half-frame tail).
            xf = Xd.T.astype(compute_dtype)
            xf = jnp.pad(xf, ((0, F_pad - F), (0, 0)))
            ola = call(xf, Wf, Ws)
            # Seam fix-up between parallel chunks: segment c*per_chunk is
            # missing second_half(frame c*per_chunk - 1) computed in chunk c-1.
            for c in range(1, num_chunks):
                row = c * per_chunk
                seam = jnp.dot(xf[row - 1], Ws,
                               preferred_element_type=jnp.float32)
                ola = ola.at[row].add(seam)
            sig = ola[:F_out].reshape(-1)                 # length (F + 1) * N
            # TODO(synk): the external `spectrogram.ispectrogram` module is not
            # available; we reproduce its standard behavior (trim
            # frame_length // 2 at each end when centered, then crop to
            # out_length) without its optional window-power renormalization.
            if center:
                sig = sig[frame_length // 2: sig.shape[0] - frame_length // 2]
            if out_length is not None:
                sig = sig[:out_length]
            return sig

        return jax.jit(run)

    try:
        return build_runner(True)(X, Wf_T, Ws_T)
    except (TypeError, ValueError, NotImplementedError, RuntimeError,
            _LOWERING_ERR):
        # pipeline_mode / Buffered is a pure pipelining/VMEM optimization; retry
        # with default double-buffering if this build rejects it.  A genuine
        # VMEM OOM only gets worse here and will still propagate.
        return build_runner(False)(X, Wf_T, Ws_T)


# ----------------------------------------------------------------------------
# Demo
# ----------------------------------------------------------------------------
if __name__ == "__main__":
    key = jax.random.PRNGKey(0)

    # Small configuration consistent with the module (defaults n_fft=2048,
    # out_length=48000; shrunk, keeping n_bins a multiple of 128 so blocks are
    # lane-aligned).
    frame_length = 256                 # len(window_function)
    n_bins = frame_length // 2         # 128 MDCT bins per frame
    n_frames = 24
    out_length = 2800                  # <= (n_frames + 1) * n_bins - frame_length

    # Princen-Bradley sine window (deterministic)
    n = np.arange(frame_length, dtype=np.float64)
    window = np.sin(np.pi * (n + 0.5) / frame_length)

    # Deterministic spectrogram input: bins x frames
    X = jax.random.normal(key, (n_bins, n_frames), dtype=jnp.float32)

    y = imdct_forward(X, window, step_length=None,
                      out_length=out_length, center=True)
    y = jax.block_until_ready(y)

    assert y.shape == (out_length,), y.shape
    assert bool(jnp.all(jnp.isfinite(y)))

    # Loose sanity check vs. a float64 numpy reference (bf16 MXU operands).
    Mw = build_windowed_imdct_matrix(n_bins, window)           # (2N, N)
    frames_ref = np.asarray(X, np.float64).T @ Mw.T            # (F, 2N)
    full = np.zeros((n_frames + 1) * n_bins, dtype=np.float64)
    for t in range(n_frames):
        full[t * n_bins: t * n_bins + frame_length] += frames_ref[t]
    ref = full[frame_length // 2: -(frame_length // 2)][:out_length]
    rel = np.linalg.norm(np.asarray(y, np.float64) - ref) / np.linalg.norm(ref)
    assert rel < 5e-2, f"relative error too large: {rel}"

    print("KERNEL_OK")
</pallas_src>

<mosaic_0001>
module attributes {stable_mosaic.version = 11 : i64} {
  func.func @k(%arg0: memref<8x128xf32, #tpu.memory_space<vmem>>, %arg1: memref<8x128xf32, #tpu.memory_space<vmem>>) attributes {dimension_semantics = [], scalar_prefetch = 0 : i64, scratch_operands = 0 : i64, tpu.core_type = #tpu.core_type<tc>} {
    %c0 = arith.constant 0 : index
    %c0_0 = arith.constant 0 : index
    %0 = vector.load %arg0[%c0, %c0_0] : memref<8x128xf32, #tpu.memory_space<vmem>>, vector<8x128xf32>
    %c1_i32 = arith.constant 1 : i32
    %1 = tpu.dynamic_rotate %0 by %c1_i32 dim 0 : vector<8x128xf32>, i32 -> vector<8x128xf32>
    %c0_1 = arith.constant 0 : index
    %c0_2 = arith.constant 0 : index
    %2 = vector.load %arg1[%c0_1, %c0_2] : memref<8x128xf32, #tpu.memory_space<vmem>>, vector<8x128xf32>
    tpu.vector_store %arg1[%c0_1, %c0_2], %1 {strides = array<i32>} : memref<8x128xf32, #tpu.memory_space<vmem>>, vector<8x128xf32>,
    return
  }
}

module attributes {stable_mosaic.version = 11 : i64} {
  func.func @_imdct_ola_kernel(%arg0: i32, %arg1: i32, %arg2: memref<16x128xbf16, #tpu.memory_space<vmem>>, %arg3: memref<128x128xbf16, #tpu.memory_space<vmem>>, %arg4: memref<128x128xbf16, #tpu.memory_space<vmem>>, %arg5: memref<16x128xf32, #tpu.memory_space<vmem>>, %arg6: memref<1x128xf32, #tpu.memory_space<vmem>>) attributes {dimension_semantics = [#tpu.dimension_semantics<parallel>, #tpu.dimension_semantics<arbitrary>], iteration_bounds = array<i64: 2, 1>, scalar_prefetch = 0 : i64, scratch_operands = 1 : i64, tpu.core_type = #tpu.core_type<tc>, window_params = [{transform_indices = @transform_0, window_bounds = array<i64: 16, 128>}, {pipeline_mode = #tpu.pipeline_mode<synchronous>, transform_indices = @transform_1, window_bounds = array<i64: 128, 128>}, {pipeline_mode = #tpu.pipeline_mode<synchronous>, transform_indices = @transform_2, window_bounds = array<i64: 128, 128>}, {transform_indices = @transform_3, window_bounds = array<i64: 16, 128>}]} {
    %c0_i32 = arith.constant 0 : i32
    %0 = arith.cmpi eq, %arg1, %c0_i32 : i32
    %1 = arith.extui %0 : i1 to i32
    %c0_i32_0 = arith.constant 0 : i32
    %2 = arith.cmpi ne, %1, %c0_i32_0 : i32
    scf.if %2 {
      %cst_13 = arith.constant 0.000000e+00 : f32
      %15 = vector.broadcast %cst_13 : f32 to vector<1x128xf32>
      %c0_14 = arith.constant 0 : index
      %c0_15 = arith.constant 0 : index
      %16 = vector.load %arg6[%c0_14, %c0_15] : memref<1x128xf32, #tpu.memory_space<vmem>>, vector<1x128xf32>
      tpu.vector_store %arg6[%c0_14, %c0_15], %15 {strides = array<i32>} : memref<1x128xf32, #tpu.memory_space<vmem>>, vector<1x128xf32>,
    } else {
    }
    %c0 = arith.constant 0 : index
    %c0_1 = arith.constant 0 : index
    %3 = vector.load %arg2[%c0, %c0_1] : memref<16x128xbf16, #tpu.memory_space<vmem>>, vector<16x128xbf16>
    %c0_2 = arith.constant 0 : index
    %c0_3 = arith.constant 0 : index
    %4 = vector.load %arg3[%c0_2, %c0_3] : memref<128x128xbf16, #tpu.memory_space<vmem>>, vector<128x128xbf16>
    %cst = arith.constant dense<0.000000e+00> : vector<16x128xf32>
    %5 = tpu.matmul %3, %4, %cst {dimension_numbers = #tpu.dot_dimension_numbers<[1], [0], [0], [1], [0, 0, 1, 1], [], []>} : vector<16x128xbf16>, vector<128x128xbf16>, vector<16x128xf32> -> vector<16x128xf32>
    %c0_4 = arith.constant 0 : index
    %c0_5 = arith.constant 0 : index
    %6 = vector.load %arg4[%c0_4, %c0_5] : memref<128x128xbf16, #tpu.memory_space<vmem>>, vector<128x128xbf16>
    %cst_6 = arith.constant dense<0.000000e+00> : vector<16x128xf32>
    %7 = tpu.matmul %3, %6, %cst_6 {dimension_numbers = #tpu.dot_dimension_numbers<[1], [0], [0], [1], [0, 0, 1, 1], [], []>} : vector<16x128xbf16>, vector<128x128xbf16>, vector<16x128xf32> -> vector<16x128xf32>
    %c0_7 = arith.constant 0 : index
    %c0_8 = arith.constant 0 : index
    %8 = vector.load %arg6[%c0_7, %c0_8] : memref<1x128xf32, #tpu.memory_space<vmem>>, vector<1x128xf32>
    %9 = vector.extract_strided_slice %7 {offsets = [0, 0], sizes = [15, 128], strides = [1, 1]} : vector<16x128xf32> to vector<15x128xf32>
    %10 = tpu.concatenate %8, %9 in 0 : vector<1x128xf32>, vector<15x128xf32> -> vector<16x128xf32>
    %11 = arith.addf %5, %10 : vector<16x128xf32>
    %c0_9 = arith.constant 0 : index
    %c0_10 = arith.constant 0 : index
    %12 = vector.load %arg5[%c0_9, %c0_10] : memref<16x128xf32, #tpu.memory_space<vmem>>, vector<16x128xf32>
    tpu.vector_store %arg5[%c0_9, %c0_10], %11 {strides = array<i32>} : memref<16x128xf32, #tpu.memory_space<vmem>>, vector<16x128xf32>,
    %13 = vector.extract_strided_slice %7 {offsets = [15, 0], sizes = [1, 128], strides = [1, 1]} : vector<16x128xf32> to vector<1x128xf32>
    %c0_11 = arith.constant 0 : index
    %c0_12 = arith.constant 0 : index
    %14 = vector.load %arg6[%c0_11, %c0_12] : memref<1x128xf32, #tpu.memory_space<vmem>>, vector<1x128xf32>
    tpu.vector_store %arg6[%c0_11, %c0_12], %13 {strides = array<i32>} : memref<1x128xf32, #tpu.memory_space<vmem>>, vector<1x128xf32>,
    return
  }
  func.func @transform_0(%arg0: i32, %arg1: i32) -> (i32, i32) {
    %c1_i32 = arith.constant 1 : i32
    %0 = arith.muli %arg0, %c1_i32 : i32
    %1 = arith.addi %0, %arg1 : i32
    %c0_i32 = arith.constant 0 : i32
    %c0_i32_0 = arith.constant 0 : i32
    return %1, %c0_i32 : i32, i32
  }
  func.func @transform_1(%arg0: i32, %arg1: i32) -> (i32, i32) {
    %c0_i32 = arith.constant 0 : i32
    %c0_i32_0 = arith.constant 0 : i32
    %c0_i32_1 = arith.constant 0 : i32
    return %c0_i32, %c0_i32_0 : i32, i32
  }
  func.func @transform_2(%arg0: i32, %arg1: i32) -> (i32, i32) {
    %c0_i32 = arith.constant 0 : i32
    %c0_i32_0 = arith.constant 0 : i32
    %c0_i32_1 = arith.constant 0 : i32
    return %c0_i32, %c0_i32_0 : i32, i32
  }
  func.func @transform_3(%arg0: i32, %arg1: i32) -> (i32, i32) {
    %c1_i32 = arith.constant 1 : i32
    %0 = arith.muli %arg0, %c1_i32 : i32
    %1 = arith.addi %0, %arg1 : i32
    %c0_i32 = arith.constant 0 : i32
    %c0_i32_0 = arith.constant 0 : i32
    return %1, %c0_i32 : i32, i32
  }
}

</mosaic_0001>

<bundles_post_ra>
// kernel: tpu_custom_call.1
= control target key start
LH: loop header
LB: loop body
LE: loop exit
PB: predicated region body
PF: predicated region fallthrough
CT: control target
= control target key end

     0   :  { %6 = vsyncpa [#allocation3], 0  ;;  %s103_s0 = inlined_call_operand.hbm [shape: f32[8,128], index: 0, kind: input, shape index: {}]   ;;  %s104_s1 = inlined_call_operand.hbm [shape: f32[8,128], index: 1, kind: output, shape index: {}]  }
   0x1   :  { %7 = vsyncpa [#allocation4], 0  ;;  %s85_s6 = smov [#allocation2]  }
   0x2   :  { %s14_s7 = sshll.u32 %s85_s6, 4  ;;  %s15_s7 = int_to_ptr.vmem [resolvable:$true] %s14_s7 }
   0x3   :  { %s49_s8 = scalar_lea.vmem %s15_s7, 128  ;;  %p54_p1 = scmp.lt.s32.totalorder %s15_s7, %s15_s7 }
   0x4   :  { %p50_p0 = scmp.ne.s32.totalorder %s15_s7, %s49_s8  ;;  %p55_p2 = scmp.lt.s32.totalorder %s49_s8, %s49_s8 }
   0x6   :  { %p56_p3 = por %p55_p2, %p54_p1 }
   0x8   :  { %p57_p4 = pnand %p56_p3, %p50_p0 }
   0xa   :  { %60 = shalt.err (!%p57_p4)
}
   0xb   :  { %17 = dma.hbm_to_vmem [thread:$0]  %s103_s0, 128, %s15_s7, [#allocation3]  }
   0xc   :  { %81 = dma.done.wait [#allocation3], 128  }
   0xd   :  { %82 = vsyncadd [#allocation3], 4294967168  ;;  %s86_s11 = smov [#allocation5]   ;;  %v21_v0 = vld [vmem:[#allocation2] sm:$0xff] }
   0xe   :  { %s30_s12 = sshll.u32 %s86_s11, 4  ;;  %v22_v1 = vrot.slane %v21_v0, 7  ;;  %s31_s12 = int_to_ptr.vmem [resolvable:$true] %s30_s12 }
   0xf   :  { %s61_s13 = scalar_lea.vmem %s31_s12, 128  ;;  %p66_p6 = scmp.lt.s32.totalorder %s31_s12, %s31_s12 }
  0x10   :  { %23 = vst [vmem:[#allocation5] sm:$0xff] %v22_v1  ;;  %p62_p5 = scmp.ne.s32.totalorder %s31_s12, %s61_s13  ;;  %p67_p7 = scmp.lt.s32.totalorder %s61_s13, %s61_s13 }
  0x12   :  { %p68_p8 = por %p67_p7, %p66_p6 }
  0x14   :  { %p69_p9 = pnand %p68_p8, %p62_p5 }
  0x16   :  { %72 = shalt.err (!%p69_p9)
}
  0x17   :  { %33 = dma.vmem_to_hbm [thread:$0]  %s31_s12, 128, %s104_s1, [#allocation4]  }
  0x18   :  { %83 = dma.done.wait [#allocation4], 128  }
  0x19   :  { %84 = vsyncadd [#allocation4], 4294967168 }
  0x1a   :  { %37 = vsyncpa [#allocation3], 1 }
  0x1b   :  { %38 = vsyncpa [#allocation4], 1 }

// kernel: run.1
= control target key start
LH: loop header
LB: loop body
LE: loop exit
PB: predicated region body
PF: predicated region fallthrough
CT: control target
= control target key end

     0   :  { %s678_s12 = smov 0   ;;  %s680_s13 = smov 0   ;;  %s766_s0 = inlined_call_operand.vmem [shape: bf16[32,128], index: 0, kind: input, shape index: {}]   ;;  %s767_s1 = inlined_call_operand.vmem [shape: bf16[128,128], index: 1, kind: input, shape index: {}]   ;;  %s768_s2 = inlined_call_operand.vmem [shape: bf16[128,128], index: 2, kind: input, shape index: {}]   ;;  %s769_s3 = inlined_call_operand.vmem [shape: f32[32,128], index: 3, kind: output, shape index: {}]  }
   0x1   :  { %s682_s14 = smov 0  }
   0x2 LB: > { %s25_s15 = sadd.s32 1, %s650_s13  ;;  %p507_p0 = scmp.ge.s32.totalorder %s654_s14, 1  ;;  %s654_s14 = sphi %s682_s14, %s13_s14   ;;  %s650_s13 = sphi %s680_s13, %s771_s13   ;;  %s646_s12 = sphi %s678_s12, %s770_s12  }
   0x3   : > { %p27_p1 = scmp.ge.s32.totalorder %s25_s15, 2  ;;  %p156_p2 = scmp.lt.s32.totalorder %s654_s14, 3 }
   0x5   : > { %s773_s15 = smov (%p27_p1, %s25_s15), 0  ;;  %p157_p3 = pnand %p507_p0, %p156_p2 }
   0x6   : > { %s508_s22 = sshll.u32 (!%p157_p3), %s646_s12, 1 }
   0x7   : > { %160 = sbr.rel (%p157_p3) target bundleno = 248 (0xf8), region = 32  ;;  %p184_p4 = scmp.lt.s32.totalorder (!%p157_p3), %s508_s22, 3 }
   0xc   : > { %v615_v0 = vld [vmem:[%s768_s2 + $0x38] sm:$0xff]   ;;  %v656_v1 = vmov 0.0   ;;  %v617_v3 = vld [vmem:[%s768_s2 + $0x30] sm:$0xff]   ;;  %vm657_vm0 = vmmov 0   ;;  %v619_v5 = vld [vmem:[%s768_s2 + $0x28] sm:$0xff]   ;;  %s775_s22 = smov (!%p184_p4, %s508_s22), 3 }
   0xd   : > { %549 = vmatprep.subr.bf16.mxu0 %v656_v1  ;;  %203 = vst [vmem:[#allocation2] sm:$0x1] %v656_v1  ;;  %569 = vmatprep.subr.bf16.mxu1 %v656_v1  ;;  %v616_v2 = vld [vmem:[%s767_s1 + $0x38] sm:$0xff]   ;;  %v618_v4 = vld [vmem:[%s767_s1 + $0x30] sm:$0xff]   ;;  %v620_v6 = vld [vmem:[%s767_s1 + $0x28] sm:$0xff]   ;;  %s509_s6 = sshll.u32 %s775_s22, 2 }
   0xe   : > { %550 = vmatpush3.bf16.msra.mxu0 %v615_v0  ;;  %565 = vmatprep.mubr.msk.bf16.mxu0 %vm657_vm0, %v656_v1  ;;  %v621_v7 = vld [vmem:[%s768_s2 + $0x20] sm:$0xff]   ;;  %v623_v9 = vld [vmem:[%s768_s2 + $0x18] sm:$0xff]   ;;  %s187_s16 = scalar_lea.vmem %s766_s0, %s509_s6  ;;  %v625_v11 = vld [vmem:[%s768_s2 + $0x10] sm:$0xff]   ;;  %s511_s30 = sshll.u32 %s775_s22, 3  ;;  %vm336_vm1 = vcmask 1040384  }
   0xf   : > { %570 = vmatpush3.bf16.msra.mxu1 %v616_v2  ;;  %551 = vmatprep.subr.bf16.mxu0 %v656_v1  ;;  %v622_v8 = vld [vmem:[%s767_s1 + $0x20] sm:$0xff]   ;;  %v624_v10 = vld [vmem:[%s767_s1 + $0x18] sm:$0xff]   ;;  %v626_v12 = vld [vmem:[%s767_s1 + $0x10] sm:$0xff]   ;;  %s195_s6 = scalar_lea.vmem %s769_s3, %s511_s30 }
  0x10   : > { %571 = vmatprep.subr.bf16.mxu1 %v656_v1  ;;  %585 = vmatprep.mubr.msk.bf16.mxu1 %vm657_vm0, %v656_v1  ;;  %v627_v13 = vld [vmem:[%s768_s2 + $0x8] sm:$0xff]   ;;  %v629_v15 = vld [vmem:[%s768_s2] sm:$0xff]  }
  0x11   : > { %v628_v14 = vld [vmem:[%s767_s1 + $0x8] sm:$0xff]   ;;  %v630_v16 = vld [vmem:[%s767_s1] sm:$0xff]  }
  0x12   : > { %552 = vmatpush3.bf16.msra.mxu0 %v617_v3  ;;  %v631_v17 = vld [vmem:[%s187_s16] sm:$0xff]  }
  0x13   : > { %572 = vmatpush3.bf16.msra.mxu1 %v618_v4  ;;  %553 = vmatprep.subr.bf16.mxu0 %v656_v1 }
  0x14   : > { %573 = vmatprep.subr.bf16.mxu1 %v656_v1  ;;  %v333_v19 = vld [vmem:[#allocation2] sm:$0x1] }
  0x16   : > { %554 = vmatpush3.bf16.msra.mxu0 %v619_v5 }
  0x17   : > { %574 = vmatpush3.bf16.msra.mxu1 %v620_v6  ;;  %555 = vmatprep.subr.bf16.mxu0 %v656_v1 }
  0x18   : > { %575 = vmatprep.subr.bf16.mxu1 %v656_v1 }
  0x1a   : > { %556 = vmatpush3.bf16.msra.mxu0 %v621_v7 }
  0x1b   : > { %576 = vmatpush3.bf16.msra.mxu1 %v622_v8  ;;  %557 = vmatprep.subr.bf16.mxu0 %v656_v1 }
  0x1c   : > { %577 = vmatprep.subr.bf16.mxu1 %v656_v1 }
  0x1e   : > { %558 = vmatpush3.bf16.msra.mxu0 %v623_v9 }
  0x1f   : > { %578 = vmatpush3.bf16.msra.mxu1 %v624_v10  ;;  %559 = vmatprep.subr.bf16.mxu0 %v656_v1 }
  0x20   : > { %579 = vmatprep.subr.bf16.mxu1 %v656_v1 }
  0x22   : > { %560 = vmatpush3.bf16.msra.mxu0 %v625_v11 }
  0x23   : > { %580 = vmatpush3.bf16.msra.mxu1 %v626_v12  ;;  %561 = vmatprep.subr.bf16.mxu0 %v656_v1 }
  0x24   : > { %581 = vmatprep.subr.bf16.mxu1 %v656_v1 }
  0x26   : > { %562 = vmatpush3.bf16.msra.mxu0 %v627_v13 }
  0x27   : > { %582 = vmatpush3.bf16.msra.mxu1 %v628_v14  ;;  %563 = vmatprep.subr.bf16.mxu0 %v656_v1 }
  0x28   : > { %583 = vmatprep.subr.bf16.mxu1 %v656_v1 }
  0x2a   : > { %564 = vmatpush3.bf16.msra.mxu0 %v629_v15 }
  0x2b   : > { %584 = vmatpush3.bf16.msra.mxu1 %v630_v16 }
  0x2d   : > { %566 = vmatmul.mubr.bf16.vlgmr.msra.gmra.mxu0 %v631_v17 }
  0x2e   : > { %586 = vmatmul.mubr.bf16.vlgmr.msra.gmra.mxu1 %v631_v17 }
  0xed   : > { %v326_v18 = vpop.f32.mrf.mxu0 }
  0xee   : > { %v337_v20 = vrot.slane %v326_v18, 7  ;;  %v425_v21 = vpop.f32.mrf.mxu1 }
  0xef   : > { %v567_v22 = vpop.f32.mrf.mxu0 }
  0xf0   : > { %v342_v23 = vsel %vm336_vm1, %v333_v19, %v337_v20  ;;  %v587_v24 = vpop.f32.mrf.mxu1 }
  0xf1   : > { %v426_v25 = vadd.f32 %v425_v21, %v342_v23  ;;  %v329_v26 = vpop.f32.mrf.mxu0 }
  0xf2   : > { %v338_v27 = vrot.slane %v329_v26, 7  ;;  %434 = vst [vmem:[#allocation2 - $0x7] sm:$0x80] %v329_v26  ;;  %v428_v28 = vpop.f32.mrf.mxu1 }
  0xf3   : > { %432 = vst [vmem:[%s195_s6] sm:$0xff] %v426_v25  ;;  %v568_v29 = vpop.f32.mrf.mxu0 }
  0xf4   : > { %v339_v30 = vsel %vm336_vm1, %v337_v20, %v338_v27  ;;  %v588_v31 = vpop.f32.mrf.mxu1 }
  0xf5   : > { %v429_v32 = vadd.f32 %v428_v28, %v339_v30 }
  0xf7   : > { %433 = vst [vmem:[%s195_s6 + $0x8] sm:$0xff] %v429_v32 }
  0xf8 PF: > { %s13_s14 = sadd.s32 1, %s654_s14   ;;  %s770_s12 = smov %s650_s13 }
  0xf9   : > { %p10_p5 = scmp.ge.s32.totalorder %s13_s14, 4   ;;  %s771_s13 = smov %s773_s15 }
  0xfb   :  { %12 = sbr.rel (!%p10_p5) target bundleno = 2 (0x2), region = 66 }

</bundles_post_ra>
